<compile_context>
chip_gen: v7x
topology: tpu7x:2x2x1
jax: 0.10.0
libtpu: 0.0.40
codegen_flags: <defaults>
</compile_context>

<pallas_src>
import functools

import jax
import jax.numpy as jnp
from jax.experimental import pallas as pl
from jax.experimental.pallas import tpu as pltpu

# ---- config (mirrors the `config.*` fields the module refers to) ----
IMG_DIM = 32              # config.img_dim
HIDDEN = 64               # config.classifier_hidden_dim
NUM_CLASSES = 2           # config.num_classes
LEAKY_SLOPE = 0.01        # nn.LeakyReLU default negative_slope
# config.f_dropout: dropout is identity in eval/inference mode (no RNG needed)

LANE = 128                # TPU vreg lane width
SUBLANE = 8               # TPU vreg sublane width


def _round_up(x, m):
    return ((x + m - 1) // m) * m


def ela_head_kernel(feat_ref, w1_ref, b1_ref, w2_ref, b2_ref, out_ref):
    # feat_ref: (tile_b, N*D) lane-dense feature tile (streamed).
    # w1_ref:   (N*D, HP)  -- W1 tiled over tokens with 1/N folded in (resident).
    # w2_ref:   (HP, CP)   -- zero-padded to a full MXU tile (resident).
    # out_ref:  (tile_b, C) -- only the real logit columns are written back.

    # Fused mean-pool + Linear(img_dim -> hidden): single MXU matmul, f32 acc.
    h = jnp.dot(feat_ref[...], w1_ref[...],
                preferred_element_type=jnp.float32) + b1_ref[...]       # (TB, HP)
    h = jnp.where(h > 0, h, LEAKY_SLOPE * h)                            # LeakyReLU

    # Dropout(config.f_dropout): identity at inference time.

    # Linear(hidden -> classes): padded (HP, CP) matmul stays in registers;
    # only the real C columns are stored (narrow writeback, no zero traffic).
    logits = jnp.dot(h, w2_ref[...],
                     preferred_element_type=jnp.float32) + b2_ref[...]  # (TB, CP)
    out_ref[...] = logits[:, :out_ref.shape[1]].astype(out_ref.dtype)


def prepare_ela_params(w1, b1, w2, b2, num_tokens, feat_dtype=jnp.float32):
    """One-time (hoisted) construction of folded / lane-padded classifier params.

    Folds the token-mean 1/N into W1 and tiles it over the N tokens so the
    kernel can contract directly against flattened (B, N*D) features.
    """
    D, H = w1.shape
    C = w2.shape[1]
    HP = _round_up(H, LANE)
    CP = _round_up(C, LANE)
    ND = num_tokens * D

    w1_fold = jnp.tile(w1.astype(jnp.float32) * (1.0 / num_tokens),
                       (num_tokens, 1))                                  # (N*D, H)
    w1p = jnp.zeros((ND, HP), jnp.float32).at[:, :H].set(w1_fold)
    w1p = w1p.astype(feat_dtype)                                         # match feat (bf16 ok)
    b1p = jnp.zeros((1, HP), jnp.float32).at[:, :H].set(b1.astype(jnp.float32))
    w2p = jnp.zeros((HP, CP), jnp.float32).at[:H, :C].set(w2.astype(jnp.float32))
    b2p = jnp.zeros((1, CP), jnp.float32).at[:, :C].set(b2.astype(jnp.float32))
    return w1p, b1p, w2p, b2p


@functools.partial(jax.jit, static_argnames=("num_classes", "tile_b"))
def ela_head(feat, w1p, b1p, w2p, b2p, *, num_classes, tile_b=None):
    """feat: (B, N, D); returns logits (B, num_classes) in float32."""
    B, N, D = feat.shape
    ND = N * D
    HP = w1p.shape[1]
    CP = w2p.shape[1]
    C = num_classes

    # Large, sublane-aligned batch tile to amortize per-grid-step overhead;
    # at tile_b=1024 the double-buffered feature tile is ~2 MiB (f32, N*D=256),
    # far under v5e/v6e/v7x scoped-VMEM defaults.  Multi-step grids shard
    # across both TensorCores on v7x via the "parallel" axis.
    if tile_b is None:
        tile_b = max(SUBLANE, min(1024, _round_up(B, SUBLANE)))

    # Free contiguous reshape: (B, N, D) -> (B, N*D) lane-dense feature rows.
    feat2d = feat.reshape(B, ND)

    out = pl.pallas_call(
        ela_head_kernel,
        out_shape=jax.ShapeDtypeStruct((B, C), jnp.float32),
        grid_spec=pltpu.PrefetchScalarGridSpec(
            num_scalar_prefetch=0,
            grid=(pl.cdiv(B, tile_b),),      # no jnp.pad: partial last block OK
            in_specs=[
                pl.BlockSpec((tile_b, ND), lambda i: (i, 0)),
                pl.BlockSpec((ND, HP), lambda i: (0, 0)),   # weights stay resident
                pl.BlockSpec((1, HP), lambda i: (0, 0)),
                pl.BlockSpec((HP, CP), lambda i: (0, 0)),
                pl.BlockSpec((1, CP), lambda i: (0, 0)),
            ],
            out_specs=pl.BlockSpec((tile_b, C), lambda i: (i, 0)),
        ),
        compiler_params=pltpu.CompilerParams(
            dimension_semantics=("parallel",)),
    )(feat2d, w1p, b1p, w2p, b2p)

    return out


def ela_head_ref(feat, w1, b1, w2, b2):
    pooled = jnp.mean(feat.astype(jnp.float32), axis=1)
    h = pooled @ w1 + b1
    h = jnp.where(h > 0, h, LEAKY_SLOPE * h)
    return h @ w2 + b2


if __name__ == "__main__":
    key = jax.random.PRNGKey(0)
    k_feat, k_w1, k_b1, k_w2, k_b2 = jax.random.split(key, 5)

    B, N = 2, 8  # small batch / token count consistent with a Swin feature map

    # Deterministic synthetic backbone features (stand-in for st_ELA output).
    feat = jax.random.normal(k_feat, (B, N, IMG_DIM), dtype=jnp.float32)

    # Deterministic classifier parameters (shapes from nn.Linear defs).
    w1 = jax.random.normal(k_w1, (IMG_DIM, HIDDEN), dtype=jnp.float32) * 0.05
    b1 = jax.random.normal(k_b1, (HIDDEN,), dtype=jnp.float32) * 0.05
    w2 = jax.random.normal(k_w2, (HIDDEN, NUM_CLASSES), dtype=jnp.float32) * 0.05
    b2 = jax.random.normal(k_b2, (NUM_CLASSES,), dtype=jnp.float32) * 0.05

    # One-time parameter fold/pad (hoisted out of the per-call path).
    w1p, b1p, w2p, b2p = prepare_ela_params(w1, b1, w2, b2, num_tokens=N,
                                            feat_dtype=feat.dtype)

    logits = ela_head(feat, w1p, b1p, w2p, b2p, num_classes=NUM_CLASSES)
    jax.block_until_ready(logits)

    ref = ela_head_ref(feat, w1, b1, w2, b2)
    assert logits.shape == (B, NUM_CLASSES)
    assert jnp.allclose(logits, ref, atol=1e-5, rtol=1e-5), "mismatch vs JAX reference"

    # Secondary check: multi-step grid with a non-dividing batch (partial block).
    B2 = 20
    feat2 = jax.random.normal(jax.random.PRNGKey(1), (B2, N, IMG_DIM),
                              dtype=jnp.float32)
    logits2 = ela_head(feat2, w1p, b1p, w2p, b2p,
                       num_classes=NUM_CLASSES, tile_b=8)
    jax.block_until_ready(logits2)
    ref2 = ela_head_ref(feat2, w1, b1, w2, b2)
    assert logits2.shape == (B2, NUM_CLASSES)
    assert jnp.allclose(logits2, ref2, atol=1e-5, rtol=1e-5), "mismatch (partial block)"

    print("KERNEL_OK")
</pallas_src>

<mosaic_0001>
module attributes {stable_mosaic.version = 11 : i64} {
  func.func @ela_head_kernel(%arg0: i32, %arg1: memref<8x256xf32, #tpu.memory_space<vmem>>, %arg2: memref<256x128xf32, #tpu.memory_space<vmem>>, %arg3: memref<1x128xf32, #tpu.memory_space<vmem>>, %arg4: memref<128x128xf32, #tpu.memory_space<vmem>>, %arg5: memref<1x128xf32, #tpu.memory_space<vmem>>, %arg6: memref<8x2xf32, #tpu.memory_space<vmem>>) attributes {dimension_semantics = [#tpu.dimension_semantics<parallel>], iteration_bounds = array<i64: 1>, scalar_prefetch = 0 : i64, scratch_operands = 0 : i64, tpu.core_type = #tpu.core_type<tc>, window_params = [{transform_indices = @transform_0, window_bounds = array<i64: 8, 256>}, {pipeline_mode = #tpu.pipeline_mode<synchronous>, transform_indices = @transform_1, window_bounds = array<i64: 256, 128>}, {pipeline_mode = #tpu.pipeline_mode<synchronous>, transform_indices = @transform_2, window_bounds = array<i64: 1, 128>}, {pipeline_mode = #tpu.pipeline_mode<synchronous>, transform_indices = @transform_3, window_bounds = array<i64: 128, 128>}, {pipeline_mode = #tpu.pipeline_mode<synchronous>, transform_indices = @transform_4, window_bounds = array<i64: 1, 128>}, {transform_indices = @transform_5, window_bounds = array<i64: 8, 2>}]} {
    %c0 = arith.constant 0 : index
    %c0_0 = arith.constant 0 : index
    %0 = vector.load %arg1[%c0, %c0_0] : memref<8x256xf32, #tpu.memory_space<vmem>>, vector<8x256xf32>
    %c0_1 = arith.constant 0 : index
    %c0_2 = arith.constant 0 : index
    %1 = vector.load %arg2[%c0_1, %c0_2] : memref<256x128xf32, #tpu.memory_space<vmem>>, vector<256x128xf32>
    %cst = arith.constant dense<0.000000e+00> : vector<8x128xf32>
    %2 = tpu.matmul %0, %1, %cst {dimension_numbers = #tpu.dot_dimension_numbers<[1], [0], [0], [1], [0, 0, 1, 1], [], []>} : vector<8x256xf32>, vector<256x128xf32>, vector<8x128xf32> -> vector<8x128xf32>
    %c0_3 = arith.constant 0 : index
    %c0_4 = arith.constant 0 : index
    %3 = vector.load %arg3[%c0_3, %c0_4] : memref<1x128xf32, #tpu.memory_space<vmem>>, vector<1x128xf32>
    %4 = vector.broadcast %3 : vector<1x128xf32> to vector<8x128xf32>
    %5 = arith.addf %2, %4 : vector<8x128xf32>
    %cst_5 = arith.constant 0.000000e+00 : f32
    %6 = vector.broadcast %cst_5 : f32 to vector<8x128xf32>
    %7 = arith.cmpf ogt, %5, %6 : vector<8x128xf32>
    %cst_6 = arith.constant 0.00999999977 : f32
    %8 = vector.broadcast %cst_6 : f32 to vector<8x128xf32>
    %9 = arith.mulf %8, %5 : vector<8x128xf32>
    %10 = arith.select %7, %5, %9 : vector<8x128xi1>, vector<8x128xf32>
    %c0_7 = arith.constant 0 : index
    %c0_8 = arith.constant 0 : index
    %11 = vector.load %arg4[%c0_7, %c0_8] : memref<128x128xf32, #tpu.memory_space<vmem>>, vector<128x128xf32>
    %cst_9 = arith.constant dense<0.000000e+00> : vector<8x128xf32>
    %12 = tpu.matmul %10, %11, %cst_9 {dimension_numbers = #tpu.dot_dimension_numbers<[1], [0], [0], [1], [0, 0, 1, 1], [], []>} : vector<8x128xf32>, vector<128x128xf32>, vector<8x128xf32> -> vector<8x128xf32>
    %c0_10 = arith.constant 0 : index
    %c0_11 = arith.constant 0 : index
    %13 = vector.load %arg5[%c0_10, %c0_11] : memref<1x128xf32, #tpu.memory_space<vmem>>, vector<1x128xf32>
    %14 = vector.broadcast %13 : vector<1x128xf32> to vector<8x128xf32>
    %15 = arith.addf %12, %14 : vector<8x128xf32>
    %16 = vector.extract_strided_slice %15 {offsets = [0, 0], sizes = [8, 2], strides = [1, 1]} : vector<8x128xf32> to vector<8x2xf32>
    %c0_12 = arith.constant 0 : index
    %c0_13 = arith.constant 0 : index
    %17 = vector.load %arg6[%c0_12, %c0_13] : memref<8x2xf32, #tpu.memory_space<vmem>>, vector<8x2xf32>
    tpu.vector_store %arg6[%c0_12, %c0_13], %16 {strides = array<i32>} : memref<8x2xf32, #tpu.memory_space<vmem>>, vector<8x2xf32>,
    return
  }
  func.func @transform_0(%arg0: i32) -> (i32, i32) {
    %c0_i32 = arith.constant 0 : i32
    %c0_i32_0 = arith.constant 0 : i32
    return %arg0, %c0_i32 : i32, i32
  }
  func.func @transform_1(%arg0: i32) -> (i32, i32) {
    %c0_i32 = arith.constant 0 : i32
    %c0_i32_0 = arith.constant 0 : i32
    %c0_i32_1 = arith.constant 0 : i32
    return %c0_i32, %c0_i32_0 : i32, i32
  }
  func.func @transform_2(%arg0: i32) -> (i32, i32) {
    %c0_i32 = arith.constant 0 : i32
    %c0_i32_0 = arith.constant 0 : i32
    %c0_i32_1 = arith.constant 0 : i32
    return %c0_i32, %c0_i32_0 : i32, i32
  }
  func.func @transform_3(%arg0: i32) -> (i32, i32) {
    %c0_i32 = arith.constant 0 : i32
    %c0_i32_0 = arith.constant 0 : i32
    %c0_i32_1 = arith.constant 0 : i32
    return %c0_i32, %c0_i32_0 : i32, i32
  }
  func.func @transform_4(%arg0: i32) -> (i32, i32) {
    %c0_i32 = arith.constant 0 : i32
    %c0_i32_0 = arith.constant 0 : i32
    %c0_i32_1 = arith.constant 0 : i32
    return %c0_i32, %c0_i32_0 : i32, i32
  }
  func.func @transform_5(%arg0: i32) -> (i32, i32) {
    %c0_i32 = arith.constant 0 : i32
    %c0_i32_0 = arith.constant 0 : i32
    return %arg0, %c0_i32 : i32, i32
  }
}

</mosaic_0001>

<bundles_post_ra>
// kernel: ela_head.1
= control target key start
LH: loop header
LB: loop body
LE: loop exit
PB: predicated region body
PF: predicated region fallthrough
CT: control target
= control target key end

     0   :  { %10 = vsyncpa [#allocation3], 0  ;;  %s634_s0 = inlined_call_operand.vmem [shape: f32[2,256], index: 0, kind: input, shape index: {}]   ;;  %s635_s1 = inlined_call_operand.hbm [shape: f32[256,128], index: 1, kind: input, shape index: {}]   ;;  %s636_s2 = inlined_call_operand.vmem [shape: f32[1,128], index: 2, kind: input, shape index: {}]   ;;  %s637_s3 = inlined_call_operand.hbm [shape: f32[128,128], index: 3, kind: input, shape index: {}]   ;;  %s638_s4 = inlined_call_operand.vmem [shape: f32[1,128], index: 4, kind: input, shape index: {}]   ;;  %s639_s5 = inlined_call_operand.hbm [shape: f32[2,2], index: 5, kind: output, shape index: {}]  }
   0x1   :  { %11 = vsyncpa [#allocation6], 0 }
   0x2   :  { %12 = vsyncpa [#allocation4], 0  ;;  %s534_s18 = smov [#allocation2]   ;;  %s462_s22 = scalar_lea.hbm %s635_s1, 4096 }
   0x3   :  { %s20_s19 = sshll.u32 %s534_s18, 4  ;;  %p463_p0 = scmp.ne.s32.totalorder %s635_s1, %s462_s22  ;;  %s21_s19 = int_to_ptr.vmem [resolvable:$true] %s20_s19 }
   0x4   :  { %p466_p1 = scmp.lt.u32.totalorder %s462_s22, %s635_s1 }
   0x6   :  { %p468_p2 = pnand %p466_p1, %p463_p0 }
   0x8   :  { %471 = shalt.err (!%p468_p2)
}
   0x9   :  { %s472_s27 = scalar_lea.vmem %s21_s19, 4096  ;;  %p477_p4 = scmp.lt.s32.totalorder %s21_s19, %s21_s19 }
   0xa   :  { %p473_p3 = scmp.ne.s32.totalorder %s21_s19, %s472_s27  ;;  %p478_p5 = scmp.lt.s32.totalorder %s472_s27, %s472_s27 }
   0xc   :  { %p479_p6 = por %p478_p5, %p477_p4 }
   0xe   :  { %p480_p7 = pnand %p479_p6, %p473_p3 }
  0x10   :  { %483 = shalt.err (!%p480_p7)
}
  0x11   :  { %s535_s28 = smov 128   ;;  %s536_s29 = smov 8  }
  0x12   :  { %26 = dma.hbm_to_vmem [thread:$0]  %s635_s1, 4096, %s21_s19, [#allocation3], %s535_s28, %s535_s28, %s536_s29  }
  0x13   :  { %s537_s7 = smov [#allocation5]   ;;  %s484_s11 = scalar_lea.hbm %s637_s3, 2048 }
  0x14   :  { %s34_s8 = sshll.u32 %s537_s7, 4  ;;  %p485_p8 = scmp.ne.s32.totalorder %s637_s3, %s484_s11  ;;  %s35_s8 = int_to_ptr.vmem [resolvable:$true] %s34_s8 }
  0x15   :  { %p488_p9 = scmp.lt.u32.totalorder %s484_s11, %s637_s3 }
  0x17   :  { %p490_p10 = pnand %p488_p9, %p485_p8 }
  0x19   :  { %493 = shalt.err (!%p490_p10)
}
  0x1a   :  { %s494_s16 = scalar_lea.vmem %s35_s8, 2048  ;;  %p499_p12 = scmp.lt.s32.totalorder %s35_s8, %s35_s8 }
  0x1b   :  { %p495_p11 = scmp.ne.s32.totalorder %s35_s8, %s494_s16  ;;  %p500_p13 = scmp.lt.s32.totalorder %s494_s16, %s494_s16 }
  0x1d   :  { %p501_p0 = por %p500_p13, %p499_p12 }
  0x1f   :  { %p502_p1 = pnand %p501_p0, %p495_p11 }
  0x21   :  { %505 = shalt.err (!%p502_p1)
}
  0x22   :  { %40 = dma.hbm_to_vmem [thread:$0]  %s637_s3, 2048, %s35_s8, [#allocation6], %s535_s28, %s535_s28, %s536_s29  }
  0x23   :  { %528 = dma.done.wait [#allocation3], 4096  }
  0x24   :  { %529 = vsyncadd [#allocation3], 4294963200 }
  0x25   :  { %530 = dma.done.wait [#allocation6], 2048  }
  0x26   :  { %531 = vsyncadd [#allocation6], 4294965248  ;;  %v538_v0 = vmov 0.0|0.0   ;;  %v69_v1 = vld [vmem:[#allocation2 + $0x80] sm:$0xff]  ;;  %v70_v2 = vld [vmem:[#allocation2 + $0x88] sm:$0xff]  ;;  %vm539_vm0 = vmmov 0  }
  0x27   :  { %423 = vmatprep.subr.bf16.mxu1 %v538_v0  ;;  %v53_v3 = vld [vmem:[#allocation2] sm:$0xff]  ;;  %v391_v4 = vpack.c.bf16 %v70_v2, %v69_v1  ;;  %v54_v5 = vld [vmem:[#allocation2 + $0x8] sm:$0xff]  ;;  %v71_v6 = vld [vmem:[#allocation2 + $0x90] sm:$0xff]  ;;  %vm282_vm2 = vcmask 15360  }
  0x28   :  { %v72_v7 = vld [vmem:[#allocation2 + $0x98] sm:$0xff]  ;;  %v393_v8 = vpack.c.bf16 %v54_v5, %v53_v3  ;;  %v55_v10 = vld [vmem:[#allocation2 + $0x10] sm:$0xff]  ;;  %v73_v12 = vld [vmem:[#allocation2 + $0xa0] sm:$0xff] }
  0x29   :  { %v395_v9 = vpack.c.bf16 %v72_v7, %v71_v6  ;;  %v56_v11 = vld [vmem:[#allocation2 + $0x18] sm:$0xff]  ;;  %392 = vmatprep.subr.bf16.mxu0 %v391_v4  ;;  %v74_v13 = vld [vmem:[#allocation2 + $0xa8] sm:$0xff]  ;;  %v57_v16 = vld [vmem:[#allocation2 + $0x20] sm:$0xff] }
  0x2a   :  { %394 = vmatpush3.bf16.msra.mxu0 %v393_v8  ;;  %v397_v14 = vpack.c.bf16 %v56_v11, %v55_v10  ;;  %v399_v15 = vpack.c.bf16 %v74_v13, %v73_v12  ;;  %v58_v17 = vld [vmem:[#allocation2 + $0x28] sm:$0xff]  ;;  %v75_v18 = vld [vmem:[#allocation2 + $0xb0] sm:$0xff]  ;;  %v76_v19 = vld [vmem:[#allocation2 + $0xb8] sm:$0xff] }
  0x2b   :  { %396 = vmatprep.subr.bf16.mxu0 %v395_v9  ;;  %v401_v20 = vpack.c.bf16 %v58_v17, %v57_v16  ;;  %v403_v21 = vpack.c.bf16 %v76_v19, %v75_v18  ;;  %v59_v22 = vld [vmem:[#allocation2 + $0x30] sm:$0xff]  ;;  %v60_v23 = vld [vmem:[#allocation2 + $0x38] sm:$0xff]  ;;  %v77_v24 = vld [vmem:[#allocation2 + $0xc0] sm:$0xff] }
  0x2c   :  { %v78_v25 = vld [vmem:[#allocation2 + $0xc8] sm:$0xff]  ;;  %v61_v26 = vld [vmem:[#allocation2 + $0x40] sm:$0xff]  ;;  %v405_v28 = vpack.c.bf16 %v60_v23, %v59_v22  ;;  %v191_v34 = vld [vmem:[#allocation5 + $0x10] sm:$0xff] }
  0x2d   :  { %v62_v27 = vld [vmem:[#allocation2 + $0x48] sm:$0xff]  ;;  %v602_v29 = vld.sshfl [vmem:[%s634_s0] sm:$0xff pattern:$0x76325410]  ;;  %v407_v32 = vpack.c.bf16 %v78_v25, %v77_v24  ;;  %v192_v35 = vld [vmem:[#allocation5 + $0x18] sm:$0xff] }
  0x2e   :  { %398 = vmatpush3.bf16.msra.mxu0 %v397_v14  ;;  %v461_v30 = vld.sshfl [vmem:[%s634_s0 + $0x8] sm:$0xff pattern:$0x76325410]  ;;  %v189_v31 = vld [vmem:[#allocation5] sm:$0xff]  ;;  %v79_v36 = vld [vmem:[#allocation2 + $0xd0] sm:$0xff]  ;;  %v409_v39 = vpack.c.bf16 %v62_v27, %v61_v26  ;;  %v427_v42 = vpack.c.bf16 %v192_v35, %v191_v34  ;;  %v540_v14 = vmov 0.0  }
  0x2f   :  { %400 = vmatprep.subr.bf16.mxu0 %v399_v15  ;;  %v190_v33 = vld [vmem:[#allocation5 + $0x8] sm:$0xff]  ;;  %v80_v37 = vld [vmem:[#allocation2 + $0xd8] sm:$0xff]  ;;  %v63_v40 = vld [vmem:[#allocation2 + $0x50] sm:$0xff]  ;;  %v113_v41 = vcombine.high %v602_v29, %v461_v30  ;;  %v112_v6 = vcombine.low %v602_v29, %v461_v30  ;;  %388 = vmatprep.mubr.msk.f32.mxu1 %vm539_vm0, %v540_v14 }
  0x30   :  { %v424_v38 = vpack.c.bf16 %v190_v33, %v189_v31  ;;  %v411_v43 = vpack.c.bf16 %v80_v37, %v79_v36  ;;  %v64_v44 = vld [vmem:[#allocation2 + $0x58] sm:$0xff]  ;;  %v193_v45 = vld [vmem:[#allocation5 + $0x20] sm:$0xff]  ;;  %v194_v46 = vld [vmem:[#allocation5 + $0x28] sm:$0xff] }
  0x31   :  { %v81_v47 = vld [vmem:[#allocation2 + $0xe0] sm:$0xff]  ;;  %v82_v48 = vld [vmem:[#allocation2 + $0xe8] sm:$0xff]  ;;  %180 = vmatprep.mubr.f32.mxu0 %v113_v41  ;;  %v413_v49 = vpack.c.bf16 %v64_v44, %v63_v40  ;;  %v430_v51 = vpack.c.bf16 %v194_v46, %v193_v45  ;;  %v195_v54 = vld [vmem:[#allocation5 + $0x30] sm:$0xff] }
  0x32   :  { %402 = vmatpush3.bf16.msra.mxu0 %v401_v20  ;;  %425 = vmatpush3.bf16.msra.mxu1 %v424_v38  ;;  %v65_v50 = vld [vmem:[#allocation2 + $0x60] sm:$0xff]  ;;  %v415_v52 = vpack.c.bf16 %v82_v48, %v81_v47  ;;  %v66_v53 = vld [vmem:[#allocation2 + $0x68] sm:$0xff]  ;;  %v196_v55 = vld [vmem:[#allocation5 + $0x38] sm:$0xff] }
  0x33   :  { %404 = vmatprep.subr.bf16.mxu0 %v403_v21  ;;  %426 = vmatprep.subr.bf16.mxu1 %v538_v0  ;;  %v83_v56 = vld [vmem:[#allocation2 + $0xf0] sm:$0xff]  ;;  %v84_v57 = vld [vmem:[#allocation2 + $0xf8] sm:$0xff]  ;;  %v417_v58 = vpack.c.bf16 %v66_v53, %v65_v50  ;;  %v433_v60 = vpack.c.bf16 %v196_v55, %v195_v54  ;;  %v197_v63 = vld [vmem:[#allocation5 + $0x40] sm:$0xff] }
  0x34   :  { %v67_v59 = vld [vmem:[#allocation2 + $0x70] sm:$0xff]  ;;  %v419_v61 = vpack.c.bf16 %v84_v57, %v83_v56  ;;  %v68_v62 = vld [vmem:[#allocation2 + $0x78] sm:$0xff]  ;;  %v198_v1 = vld [vmem:[#allocation5 + $0x48] sm:$0xff] }
  0x35   :  { %v421_v2 = vpack.c.bf16 %v68_v62, %v67_v59  ;;  %v436_v3 = vpack.c.bf16 %v198_v1, %v197_v63  ;;  %v199_v4 = vld [vmem:[#allocation5 + $0x50] sm:$0xff]  ;;  %v200_v5 = vld [vmem:[#allocation5 + $0x58] sm:$0xff]  ;;  %v201_v8 = vld [vmem:[#allocation5 + $0x60] sm:$0xff] }
  0x36   :  { %406 = vmatpush3.bf16.msra.mxu0 %v405_v28  ;;  %428 = vmatpush3.bf16.msra.mxu1 %v427_v42  ;;  %v439_v7 = vpack.c.bf16 %v200_v5, %v199_v4  ;;  %v202_v9 = vld [vmem:[#allocation5 + $0x68] sm:$0xff]  ;;  %v203_v11 = vld [vmem:[#allocation5 + $0x70] sm:$0xff]  ;;  %v204_v12 = vld [vmem:[#allocation5 + $0x78] sm:$0xff] }
  0x37   :  { %408 = vmatprep.subr.bf16.mxu0 %v407_v32  ;;  %429 = vmatprep.subr.bf16.mxu1 %v538_v0  ;;  %v442_v10 = vpack.c.bf16 %v202_v9, %v201_v8  ;;  %v445_v13 = vpack.c.bf16 %v204_v12, %v203_v11  ;;  %v302_v16 = vld [vmem:[%s636_s2] ss:$0 sm:$0xff] }
  0x3a   :  { %410 = vmatpush3.bf16.msra.mxu0 %v409_v39  ;;  %431 = vmatpush3.bf16.msra.mxu1 %v430_v51 }
  0x3b   :  { %412 = vmatprep.subr.bf16.mxu0 %v411_v43  ;;  %432 = vmatprep.subr.bf16.mxu1 %v538_v0 }
  0x3e   :  { %414 = vmatpush3.bf16.msra.mxu0 %v413_v49  ;;  %434 = vmatpush3.bf16.msra.mxu1 %v433_v60 }
  0x3f   :  { %416 = vmatprep.subr.bf16.mxu0 %v415_v52  ;;  %435 = vmatprep.subr.bf16.mxu1 %v538_v0 }
  0x42   :  { %418 = vmatpush3.bf16.msra.mxu0 %v417_v58  ;;  %437 = vmatpush3.bf16.msra.mxu1 %v436_v3 }
  0x43   :  { %420 = vmatprep.subr.bf16.mxu0 %v419_v61  ;;  %438 = vmatprep.subr.bf16.mxu1 %v538_v0 }
  0x46   :  { %422 = vmatpush3.bf16.msra.mxu0 %v421_v2  ;;  %440 = vmatpush3.bf16.msra.mxu1 %v439_v7 }
  0x47   :  { %441 = vmatprep.subr.bf16.mxu1 %v538_v0 }
  0x49   :  { %181 = vmatmul.mubr.f32.vlgmr.msra.gmra.mrb[0].mxu0 %v112_v6 }
  0x4a   :  { %443 = vmatpush3.bf16.msra.mxu1 %v442_v10 }
  0x4b   :  { %444 = vmatprep.subr.bf16.mxu1 %v538_v0  ;;  %v303_v0 = vld [vmem:[%s638_s4] ss:$0 sm:$0xff] }
  0x4e   :  { %446 = vmatpush3.bf16.msra.mxu1 %v445_v13 }
 0x11c   :  { %v336_v15 = vpop.f32.mrb[0].mxu0 }
 0x11d   :  { %v337_v17 = vpop.f32.mrb[1].mxu0 }
 0x11e   :  { %v338_v18 = vadd.f32 %v337_v17, %v336_v15 }
 0x120   :  { %v183_v19 = vadd.f32 %v338_v18, %v302_v16 }
 0x122   :  { %vm186_vm1 = vcmp.gt.f32.partialorder %v183_v19, 0.0  ;;  %v187_v20 = vmul.f32 0.01, %v183_v19 }
 0x124   :  { %v188_v21 = vsel %vm186_vm1, %v183_v19, %v187_v20 }
 0x125   :  { %389 = vmatmul.mubr.f32.vlgmr.msra.gmra.mrb[0].mxu1 %v188_v21 }
 0x1f8   :  { %v278_v22 = vpop.f32.mrb[0].mxu1 }
 0x1f9   :  { %v279_v23 = vadd.f32 %v303_v0, %v278_v22  ;;  %v390_v24 = vpop.f32.mrb[1].mxu1 }
 0x1fb   :  { %283 = vst.msk [vmem:[#allocation7] sm:$0xff] %vm282_vm2, %v279_v23 }
 0x1fc   :  { %288 = vsyncadd [#allocation4], 96  ;;  %s541_s24 = smov [#allocation7]  }
 0x1fd   :  { %s289_s25 = sshll.u32 %s541_s24, 4  ;;  %s290_s25 = int_to_ptr.vmem [resolvable:$true] %s289_s25 }
 0x1fe   :  { %s506_s2 = scalar_lea.vmem %s290_s25, 32  ;;  %s510_s26 = scalar_lea.vmem %s290_s25, 128 }
 0x1ff   :  { %p507_p2 = scmp.ne.s32.totalorder %s290_s25, %s506_s2  ;;  %p511_p3 = scmp.lt.s32.totalorder %s290_s25, %s290_s25 }
 0x200   :  { %p512_p4 = scmp.lt.s32.totalorder %s510_s26, %s506_s2 }
 0x202   :  { %p513_p5 = por %p512_p4, %p511_p3 }
 0x204   :  { %p514_p6 = pnand %p513_p5, %p507_p2 }
 0x206   :  { %517 = shalt.err (!%p514_p6)
}
 0x207   :  { %s518_s4 = scalar_lea.hbm %s639_s5, 32 }
 0x208   :  { %p519_p7 = scmp.ne.s32.totalorder %s639_s5, %s518_s4  ;;  %p522_p8 = scmp.lt.u32.totalorder %s518_s4, %s639_s5 }
 0x20a   :  { %p524_p9 = pnand %p522_p8, %p519_p7 }
 0x20c   :  { %527 = shalt.err (!%p524_p9)
}
 0x20d   :  { %s542_s8 = smov 32   ;;  %s543_s9 = smov 2  }
 0x20e   :  { %295 = dma.vmem_to_hbm [thread:$0]  %s290_s25, 32, %s639_s5, [#allocation4], %s542_s8, %s542_s8, %s543_s9  }
 0x20f   :  { %532 = dma.done.wait [#allocation4], 128  }
 0x210   :  { %533 = vsyncadd [#allocation4], 4294967168 }
 0x211   :  { %299 = vsyncpa [#allocation3], 1 }
 0x212   :  { %300 = vsyncpa [#allocation6], 1 }
 0x213   :  { %301 = vsyncpa [#allocation4], 1 }

</bundles_post_ra>
